<compile_context>
chip_gen: v6e
topology: v6e:2x2x1
jax: 0.10.0
libtpu: 0.0.40
codegen_flags: <defaults>
</compile_context>

<pallas_src>
import functools

import jax
import jax.numpy as jnp
from jax import lax
from jax.experimental import pallas as pl
from jax.experimental.pallas import tpu as pltpu

LANES = 128
MAX_TILE_BYTES = 4 * 1024 * 1024   # per-input per-buffer tile budget (4 MiB)


def _round_up(x, m):
    return (x + m - 1) // m * m


def _num_tensorcores():
    """2 on v7x (2 TensorCores per chip); 1 on v5e/v6e (and as a safe fallback)."""
    try:
        dev = jax.devices()[0]
        if dev.platform != "tpu":
            return 1
        kind = dev.device_kind.lower()
    except Exception:
        return 1
    if "7x" in kind or "v7" in kind:
        return 2
    return 1


def _iou_partial_kernel(o_ref, t_ref, part_ref, *, rows, tile_rows,
                        blocks_per_core, full_blocks, has_ragged, has_dup,
                        num_cores):
    if num_cores == 1:
        c = 0
        i = pl.program_id(0)
    else:
        c = pl.program_id(0)   # "parallel" axis (per-TensorCore partial)
        i = pl.program_id(1)   # "arbitrary" reduction axis

    @pl.when(i == 0)
    def _():
        part_ref[...] = jnp.zeros_like(part_ref)

    b = c * blocks_per_core + i   # global block index

    def accumulate(mask_tail):
        # Threshold in-kernel, on the native-dtype tile.
        o = (o_ref[...] > 0.5).astype(jnp.float32)
        t = (t_ref[...] > 0.5).astype(jnp.float32)
        inter = o * t
        total = o + t
        if mask_tail:
            # Zero out rows past the true row count (ragged last block only).
            row_ids = b * tile_rows + lax.broadcasted_iota(
                jnp.int32, (tile_rows, LANES), 0)
            valid = row_ids < rows
            inter = jnp.where(valid, inter, 0.0)
            total = jnp.where(valid, total, 0.0)
        # Fold the (tile_rows, 128) tile into an (8, 128) vector accumulator
        # with plain elementwise adds; cross-lane reduce happens once in JAX.
        part_ref[0, :, :] += jnp.sum(
            inter.reshape(tile_rows // 8, 8, LANES), axis=0)
        part_ref[1, :, :] += jnp.sum(
            total.reshape(tile_rows // 8, 8, LANES), axis=0)

    if not has_ragged and not has_dup:
        # No ragged tail, no clamped duplicate blocks: unconditional fast path.
        accumulate(False)
    else:
        if full_blocks > 0:
            @pl.when(b < full_blocks)
            def _():
                accumulate(False)           # interior tiles: no mask

        if has_ragged:
            @pl.when(b == full_blocks)
            def _():
                accumulate(True)            # single ragged edge tile: masked

        # Blocks with b > full_blocks (clamped duplicates from the 2-core
        # split) fall through both branches and contribute nothing.


def iou_score(outputs, targets, smooth=1e-6):
    assert outputs.shape == targets.shape
    o = outputs.reshape(-1)
    t = targets.reshape(-1)
    n = o.shape[0]

    # Pad with zeros only up to the next multiple of 128 when necessary
    # (0 > 0.5 is False, so padding contributes nothing to any sum).
    rem = n % LANES
    if rem:
        o = jnp.pad(o, (0, LANES - rem))
        t = jnp.pad(t, (0, LANES - rem))
    rows = o.shape[0] // LANES

    itemsize = jnp.dtype(o.dtype).itemsize
    packing = 8 * max(1, 4 // itemsize)            # 8 f32 / 16 bf16 / 32 int8
    max_tile_rows = MAX_TILE_BYTES // (LANES * itemsize)
    max_tile_rows = max(packing, (max_tile_rows // packing) * packing)
    tile_rows = min(max_tile_rows, _round_up(rows, packing))

    blocks_total = pl.cdiv(rows, tile_rows)
    num_cores = min(_num_tensorcores(), blocks_total)
    blocks_per_core = pl.cdiv(blocks_total, num_cores)

    full_blocks = rows // tile_rows                       # fully-valid blocks
    has_ragged = full_blocks != blocks_total              # one partial block
    has_dup = num_cores * blocks_per_core != blocks_total # clamped duplicates
    last_block = blocks_total - 1

    o2 = o.reshape(rows, LANES)
    t2 = t.reshape(rows, LANES)

    kernel = functools.partial(
        _iou_partial_kernel,
        rows=rows,
        tile_rows=tile_rows,
        blocks_per_core=blocks_per_core,
        full_blocks=full_blocks,
        has_ragged=has_ragged,
        has_dup=has_dup,
        num_cores=num_cores,
    )

    if num_cores == 1:
        grid = (blocks_total,)
        semantics = ("arbitrary",)
        in_map = lambda i: (i, 0)
        out_map = lambda i: (0, 0, 0)
    else:
        grid = (num_cores, blocks_per_core)
        semantics = ("parallel", "arbitrary")
        if has_dup:
            # Clamp so the DMA never indexes past the array; the kernel skips
            # compute for the duplicated blocks entirely.
            in_map = lambda c, i: (
                jnp.minimum(c * blocks_per_core + i, last_block), 0)
        else:
            in_map = lambda c, i: (c * blocks_per_core + i, 0)
        out_map = lambda c, i: (c, 0, 0)

    partials = pl.pallas_call(
        kernel,
        out_shape=jax.ShapeDtypeStruct((num_cores * 2, 8, LANES), jnp.float32),
        grid_spec=pltpu.PrefetchScalarGridSpec(
            num_scalar_prefetch=0,
            grid=grid,
            in_specs=[
                pl.BlockSpec((tile_rows, LANES), in_map),
                pl.BlockSpec((tile_rows, LANES), in_map),
            ],
            out_specs=pl.BlockSpec((2, 8, LANES), out_map),
        ),
        compiler_params=pltpu.CompilerParams(
            dimension_semantics=semantics,
            vmem_limit_bytes=32 * 1024 * 1024,
        ),
    )(o2, t2)

    # Final cross-lane reduction + scalar IoU math (cheap, done once in JAX).
    # Note: f32 accumulator elements hold integer counts; exact up to 2^24 per
    # lane-element per core, i.e. ~10^10+ total elements -- plenty.
    partials = partials.reshape(num_cores, 2, 8, LANES)
    inter = jnp.sum(partials[:, 0])
    total = jnp.sum(partials[:, 1])
    union = total - inter
    return (inter + smooth) / (union + smooth)


def iou_score_ref(outputs, targets, smooth=1e-6):
    o = (outputs > 0.5).astype(jnp.float32).reshape(-1)
    t = (targets > 0.5).astype(jnp.float32).reshape(-1)
    inter = jnp.sum(o * t)
    union = jnp.sum(o) + jnp.sum(t) - inter
    return (inter + smooth) / (union + smooth)


if __name__ == "__main__":
    key = jax.random.PRNGKey(0)
    k1, k2, k3, k4 = jax.random.split(key, 4)

    # NCHW: batch=2, channels=4, spatial=16x16 (e.g. sigmoid probs / masks)
    outputs = jax.random.uniform(k1, (2, 4, 16, 16), dtype=jnp.float32)
    targets = jax.random.uniform(k2, (2, 4, 16, 16), dtype=jnp.float32)

    got = jax.block_until_ready(iou_score(outputs, targets))
    want = jax.block_until_ready(iou_score_ref(outputs, targets))
    assert jnp.allclose(got, want, rtol=1e-5, atol=1e-6), (got, want)

    # Ragged case (N not a multiple of 128) exercises the masked edge path.
    outputs2 = jax.random.uniform(k3, (1, 3, 7, 5), dtype=jnp.float32)
    targets2 = jax.random.uniform(k4, (1, 3, 7, 5), dtype=jnp.float32)
    got2 = jax.block_until_ready(iou_score(outputs2, targets2))
    want2 = jax.block_until_ready(iou_score_ref(outputs2, targets2))
    assert jnp.allclose(got2, want2, rtol=1e-5, atol=1e-6), (got2, want2)

    # bf16 inputs exercise the dtype-aware (16,128) tile packing.
    outputs3 = outputs.astype(jnp.bfloat16)
    targets3 = targets.astype(jnp.bfloat16)
    got3 = jax.block_until_ready(iou_score(outputs3, targets3))
    want3 = jax.block_until_ready(iou_score_ref(outputs3, targets3))
    assert jnp.allclose(got3, want3, rtol=1e-5, atol=1e-6), (got3, want3)

    print("KERNEL_OK")
</pallas_src>

<mosaic_0001>
module attributes {stable_mosaic.version = 11 : i64} {
  func.func @_iou_partial_kernel(%arg0: i32, %arg1: memref<16x128xf32, #tpu.memory_space<vmem>>, %arg2: memref<16x128xf32, #tpu.memory_space<vmem>>, %arg3: memref<2x8x128xf32, #tpu.memory_space<vmem>>) attributes {dimension_semantics = [#tpu.dimension_semantics<arbitrary>], iteration_bounds = array<i64: 1>, scalar_prefetch = 0 : i64, scratch_operands = 0 : i64, tpu.core_type = #tpu.core_type<tc>, window_params = [{transform_indices = @transform_0, window_bounds = array<i64: 16, 128>}, {transform_indices = @transform_1, window_bounds = array<i64: 16, 128>}, {pipeline_mode = #tpu.pipeline_mode<synchronous>, transform_indices = @transform_2, window_bounds = array<i64: 2, 8, 128>}]} {
    %c0_i32 = arith.constant 0 : i32
    %0 = arith.cmpi eq, %arg0, %c0_i32 : i32
    %1 = arith.extui %0 : i1 to i32
    %c0_i32_0 = arith.constant 0 : i32
    %2 = arith.cmpi ne, %1, %c0_i32_0 : i32
    scf.if %2 {
      %cst_18 = arith.constant 0.000000e+00 : f32
      %31 = vector.broadcast %cst_18 : f32 to vector<2x8x128xf32>
      %c0_19 = arith.constant 0 : index
      %c0_20 = arith.constant 0 : index
      %c0_21 = arith.constant 0 : index
      %32 = vector.load %arg3[%c0_19, %c0_20, %c0_21] : memref<2x8x128xf32, #tpu.memory_space<vmem>>, vector<2x8x128xf32>
      tpu.vector_store %arg3[%c0_19, %c0_20, %c0_21], %31 {strides = array<i32>} : memref<2x8x128xf32, #tpu.memory_space<vmem>>, vector<2x8x128xf32>,
    } else {
    }
    %c0 = arith.constant 0 : index
    %c0_1 = arith.constant 0 : index
    %3 = vector.load %arg1[%c0, %c0_1] : memref<16x128xf32, #tpu.memory_space<vmem>>, vector<16x128xf32>
    %cst = arith.constant 5.000000e-01 : f32
    %4 = vector.broadcast %cst : f32 to vector<16x128xf32>
    %5 = arith.cmpf ogt, %3, %4 : vector<16x128xf32>
    %6 = arith.extui %5 : vector<16x128xi1> to vector<16x128xi32>
    %7 = arith.sitofp %6 : vector<16x128xi32> to vector<16x128xf32>
    %c0_2 = arith.constant 0 : index
    %c0_3 = arith.constant 0 : index
    %8 = vector.load %arg2[%c0_2, %c0_3] : memref<16x128xf32, #tpu.memory_space<vmem>>, vector<16x128xf32>
    %cst_4 = arith.constant 5.000000e-01 : f32
    %9 = vector.broadcast %cst_4 : f32 to vector<16x128xf32>
    %10 = arith.cmpf ogt, %8, %9 : vector<16x128xf32>
    %11 = arith.extui %10 : vector<16x128xi1> to vector<16x128xi32>
    %12 = arith.sitofp %11 : vector<16x128xi32> to vector<16x128xf32>
    %13 = arith.mulf %7, %12 : vector<16x128xf32>
    %14 = arith.addf %7, %12 : vector<16x128xf32>
    %c0_5 = arith.constant 0 : index
    %c0_6 = arith.constant 0 : index
    %c0_7 = arith.constant 0 : index
    %15 = vector.load %arg3[%c0_5, %c0_6, %c0_7] : memref<2x8x128xf32, #tpu.memory_space<vmem>>, vector<1x8x128xf32>
    %16 = vector.shape_cast %15 : vector<1x8x128xf32> to vector<8x128xf32>
    %17 = vector.shape_cast %13 : vector<16x128xf32> to vector<2x8x128xf32>
    %cst_8 = arith.constant dense<0.000000e+00> : vector<8x128xf32>
    %18 = vector.multi_reduction <add>, %17, %cst_8 [0] : vector<2x8x128xf32> to vector<8x128xf32>
    %19 = arith.addf %16, %18 : vector<8x128xf32>
    %c0_9 = arith.constant 0 : index
    %c0_10 = arith.constant 0 : index
    %c0_11 = arith.constant 0 : index
    %20 = vector.load %arg3[%c0_9, %c0_10, %c0_11] : memref<2x8x128xf32, #tpu.memory_space<vmem>>, vector<1x8x128xf32>
    %21 = vector.shape_cast %20 : vector<1x8x128xf32> to vector<8x128xf32>
    %22 = vector.shape_cast %19 : vector<8x128xf32> to vector<1x8x128xf32>
    tpu.vector_store %arg3[%c0_9, %c0_10, %c0_11], %22 {strides = array<i32>} : memref<2x8x128xf32, #tpu.memory_space<vmem>>, vector<1x8x128xf32>,
    %c1 = arith.constant 1 : index
    %c0_12 = arith.constant 0 : index
    %c0_13 = arith.constant 0 : index
    %23 = vector.load %arg3[%c1, %c0_12, %c0_13] : memref<2x8x128xf32, #tpu.memory_space<vmem>>, vector<1x8x128xf32>
    %24 = vector.shape_cast %23 : vector<1x8x128xf32> to vector<8x128xf32>
    %25 = vector.shape_cast %14 : vector<16x128xf32> to vector<2x8x128xf32>
    %cst_14 = arith.constant dense<0.000000e+00> : vector<8x128xf32>
    %26 = vector.multi_reduction <add>, %25, %cst_14 [0] : vector<2x8x128xf32> to vector<8x128xf32>
    %27 = arith.addf %24, %26 : vector<8x128xf32>
    %c1_15 = arith.constant 1 : index
    %c0_16 = arith.constant 0 : index
    %c0_17 = arith.constant 0 : index
    %28 = vector.load %arg3[%c1_15, %c0_16, %c0_17] : memref<2x8x128xf32, #tpu.memory_space<vmem>>, vector<1x8x128xf32>
    %29 = vector.shape_cast %28 : vector<1x8x128xf32> to vector<8x128xf32>
    %30 = vector.shape_cast %27 : vector<8x128xf32> to vector<1x8x128xf32>
    tpu.vector_store %arg3[%c1_15, %c0_16, %c0_17], %30 {strides = array<i32>} : memref<2x8x128xf32, #tpu.memory_space<vmem>>, vector<1x8x128xf32>,
    return
  }
  func.func @transform_0(%arg0: i32) -> (i32, i32) {
    %c0_i32 = arith.constant 0 : i32
    %c0_i32_0 = arith.constant 0 : i32
    return %arg0, %c0_i32 : i32, i32
  }
  func.func @transform_1(%arg0: i32) -> (i32, i32) {
    %c0_i32 = arith.constant 0 : i32
    %c0_i32_0 = arith.constant 0 : i32
    return %arg0, %c0_i32 : i32, i32
  }
  func.func @transform_2(%arg0: i32) -> (i32, i32, i32) {
    %c0_i32 = arith.constant 0 : i32
    %c0_i32_0 = arith.constant 0 : i32
    %c0_i32_1 = arith.constant 0 : i32
    %c0_i32_2 = arith.constant 0 : i32
    return %c0_i32, %c0_i32_0, %c0_i32_1 : i32, i32, i32
  }
}

</mosaic_0001>

<bundles_post_ra>
// kernel: tpu_custom_call.1
= control target key start
LH: loop header
LB: loop body
LE: loop exit
PB: predicated region body
PF: predicated region fallthrough
CT: control target
= control target key end

     0   :  { %7 = vsyncpa [#allocation3], 0  ;;  %s208_s0 = inlined_call_operand.hbm [shape: f32[16,128], index: 0, kind: input, shape index: {}]   ;;  %s209_s1 = inlined_call_operand.hbm [shape: f32[16,128], index: 1, kind: input, shape index: {}]   ;;  %s210_s2 = inlined_call_operand.hbm [shape: f32[2,8,128], index: 2, kind: output, shape index: {}]  }
   0x1   :  { %8 = vsyncpa [#allocation6], 0 }
   0x2   :  { %9 = vsyncpa [#allocation4], 0  ;;  %s169_s9 = smov [#allocation2]  }
   0x3   :  { %s15_s10 = sshll.u32 %s169_s9, 4  ;;  %s16_s10 = int_to_ptr.vmem [resolvable:$true] %s15_s10 }
   0x4   :  { %s111_s11 = scalar_lea.vmem %s16_s10, 256  ;;  %p116_p1 = scmp.lt.s32.totalorder %s16_s10, %s16_s10 }
   0x5   :  { %p112_p0 = scmp.ne.s32.totalorder %s16_s10, %s111_s11  ;;  %p117_p2 = scmp.lt.s32.totalorder %s111_s11, %s111_s11 }
   0x7   :  { %p118_p3 = por %p117_p2, %p116_p1 }
   0x9   :  { %p119_p4 = pnand %p118_p3, %p112_p0 }
   0xb   :  { %122 = shalt.err (!%p119_p4)
}
   0xc   :  { %s170_s12 = smov 128   ;;  %s171_s13 = smov 8  }
   0xd   :  { %21 = dma.hbm_to_vmem [thread:$0]  %s208_s0, 256, %s16_s10, [#allocation3], %s170_s12, %s170_s12, %s171_s13  }
   0xe   :  { %s172_s16 = smov [#allocation5]  }
   0xf   :  { %s27_s17 = sshll.u32 %s172_s16, 4  ;;  %s28_s17 = int_to_ptr.vmem [resolvable:$true] %s27_s17 }
  0x10   :  { %s131_s18 = scalar_lea.vmem %s28_s17, 256  ;;  %p136_p6 = scmp.lt.s32.totalorder %s28_s17, %s28_s17 }
  0x11   :  { %p132_p5 = scmp.ne.s32.totalorder %s28_s17, %s131_s18  ;;  %p137_p7 = scmp.lt.s32.totalorder %s131_s18, %s131_s18 }
  0x13   :  { %p138_p8 = por %p137_p7, %p136_p6 }
  0x15   :  { %p139_p9 = pnand %p138_p8, %p132_p5 }
  0x17   :  { %142 = shalt.err (!%p139_p9)
}
  0x18   :  { %33 = dma.hbm_to_vmem [thread:$0]  %s209_s1, 256, %s28_s17, [#allocation6], %s170_s12, %s170_s12, %s171_s13  }
  0x19   :  { %163 = dma.done.wait [#allocation3], 256  }
  0x1a   :  { %164 = vsyncadd [#allocation3], 4294967040 }
  0x1b   :  { %165 = dma.done.wait [#allocation6], 256  }
  0x1c   :  { %166 = vsyncadd [#allocation6], 4294967040  ;;  %v46_v0 = vld [vmem:[#allocation2] sm:$0xff]  ;;  %v47_v1 = vld [vmem:[#allocation2 + $0x8] sm:$0xff]  ;;  %v173_v4 = vmov 0.0   ;;  %s174_s0 = smov [#allocation7]  }
  0x1d   :  { %v54_v2 = vld [vmem:[#allocation5] sm:$0xff]  ;;  %vm48_vm0 = vcmp.gt.f32.partialorder %v46_v0, 0.5  ;;  %vm49_vm1 = vcmp.gt.f32.partialorder %v47_v1, 0.5  ;;  %v55_v3 = vld [vmem:[#allocation5 + $0x8] sm:$0xff]  ;;  %s80_s1 = sshll.u32 %s174_s0, 4  ;;  %s81_s1 = int_to_ptr.vmem [resolvable:$true] %s80_s1 }
  0x1e   :  { %vm56_vm2 = vcmp.gt.f32.partialorder %v54_v2, 0.5  ;;  %v93_v5 = vsel %vm48_vm0, 1.0, %v173_v4  ;;  %v94_v6 = vsel %vm49_vm1, 1.0, %v173_v4  ;;  %vm57_vm3 = vcmp.gt.f32.partialorder %v55_v3, 0.5  ;;  %s143_s21 = scalar_lea.vmem %s81_s1, 256  ;;  %p148_p11 = scmp.lt.s32.totalorder %s81_s1, %s81_s1 }
  0x1f   :  { %v95_v7 = vsel %vm56_vm2, 1.0, %v173_v4  ;;  %v96_v8 = vsel %vm57_vm3, 1.0, %v173_v4  ;;  %p144_p10 = scmp.ne.s32.totalorder %s81_s1, %s143_s21  ;;  %p149_p12 = scmp.lt.s32.totalorder %s143_s21, %s143_s21 }
  0x20   :  { %v62_v9 = vmul.f32 %v95_v7, %v93_v5  ;;  %v64_v10 = vadd.f32 %v95_v7, %v93_v5  ;;  %v63_v11 = vmul.f32 %v96_v8, %v94_v6  ;;  %v65_v12 = vadd.f32 %v96_v8, %v94_v6 }
  0x21   :  { %p150_p13 = por %p149_p12, %p148_p11 }
  0x22   :  { %v67_v13 = vadd.f32 %v63_v11, %v62_v9  ;;  %v72_v14 = vadd.f32 %v65_v12, %v64_v10 }
  0x23   :  { %p151_p0 = pnand %p150_p13, %p144_p10 }
  0x24   :  { %69 = vst [vmem:[#allocation7] sm:$0xff] %v67_v13  ;;  %74 = vst [vmem:[#allocation7 + $0x8] sm:$0xff] %v72_v14 }
  0x25   :  { %154 = shalt.err (!%p151_p0)
}
  0x26   :  { %86 = dma.vmem_to_hbm [thread:$0]  %s81_s1, 256, %s210_s2, [#allocation4], %s170_s12, %s170_s12, %s171_s13  }
  0x27   :  { %167 = dma.done.wait [#allocation4], 256  }
  0x28   :  { %168 = vsyncadd [#allocation4], 4294967040 }
  0x29   :  { %90 = vsyncpa [#allocation3], 1 }
  0x2a   :  { %91 = vsyncpa [#allocation6], 1 }
  0x2b   :  { %92 = vsyncpa [#allocation4], 1 }

</bundles_post_ra>
